<compile_context>
chip_gen: v7x
topology: tpu7x:2x2x1
jax: 0.10.0
libtpu: 0.0.40
codegen_flags: <defaults>
</compile_context>

<pallas_src>
import math

import jax
import jax.numpy as jnp
from jax.experimental import pallas as pl
from jax.experimental.pallas import tpu as pltpu


def _round_up(x, m):
    return ((x + m - 1) // m) * m


def _downsample_kernel(x0_ref, x1_ref, x2_ref, w_ref, b_ref, o_ref):
    """One (batch, row-tile) grid step.

    x{kh}_ref : (1, Pt, 3*Cin)  kw-concatenated taps for kernel row kh (bf16)
    w_ref     : (3, 3*Cin, Cout) flattened weight, resident for the whole grid
    b_ref     : (1, Cout)        bias (f32), resident
    o_ref     : (1, Pt, Cout)    lane-dense flattened output block
    """
    # Straight MXU chain into a single f32 accumulator; bias folded at the end
    # (no zeros() materialization, no interleaved relayout work).
    acc = jnp.dot(x0_ref[0], w_ref[0], preferred_element_type=jnp.float32)
    acc = acc + jnp.dot(x1_ref[0], w_ref[1], preferred_element_type=jnp.float32)
    acc = acc + jnp.dot(x2_ref[0], w_ref[2], preferred_element_type=jnp.float32)
    acc = acc + b_ref[...].astype(jnp.float32)
    o_ref[0] = acc.astype(o_ref.dtype)


def downsample_forward(x_nchw, weight_oihw, bias, temb=None, *,
                       compute_dtype=jnp.bfloat16):
    """Equivalent of DownSample.forward(x, temb): 3x3 conv, stride 2, padding 1."""
    del temb  # unused, as in the PyTorch module
    N, C, H, W = x_nchw.shape
    Cout, Cin, KH, KW = weight_oihw.shape
    assert (Cin, KH, KW) == (C, 3, 3)

    # Output spatial size of a stride-2, pad-1, 3x3 conv.
    Ho = (H + 2 - 3) // 2 + 1
    Wo = (W + 2 - 3) // 2 + 1
    P = Ho * Wo

    cdt = compute_dtype if compute_dtype is not None else x_nchw.dtype
    out_dtype = x_nchw.dtype
    x_b = jnp.dtype(cdt).itemsize
    o_b = jnp.dtype(out_dtype).itemsize

    # ---- XLA-side glue (fuses; no in-kernel slicing / reshaping needed) -----
    x = jnp.transpose(x_nchw, (0, 2, 3, 1)).astype(cdt)          # NHWC, bf16
    xp = jnp.pad(x, ((0, 0), (1, 1), (1, 1), (0, 0)))            # zero pad 1/side

    # For each kernel row kh: gather the three kw taps, concatenate them on the
    # channel (lane) axis and flatten (Ho, Wo) -> P.  Tap (kh, kw) of output
    # (i, j) is xp[2i+kh, 2j+kw].
    xs = []
    for kh in range(3):
        taps = [xp[:, kh::2, kw::2, :][:, :Ho, :Wo, :] for kw in range(3)]
        xs.append(jnp.concatenate(taps, axis=-1).reshape(N, P, 3 * Cin))

    # Weight (O, I, KH, KW) -> (KH, KW*Cin contraction, O), matching the
    # kw-major channel concatenation above.
    w = jnp.transpose(weight_oihw, (2, 3, 1, 0)).astype(cdt)     # (3, 3, Cin, Cout)
    w = w.reshape(3, 3 * Cin, Cout)
    b2 = bias.reshape(1, Cout).astype(jnp.float32)

    # ---- tile selection: Pt rows of the flattened spatial axis --------------
    def vmem_need(pt):
        return (2 * (3 * pt * 3 * Cin * x_b + pt * Cout * o_b)   # dbl-buffered in/out
                + 3 * 3 * Cin * Cout * x_b + Cout * 4            # resident weight/bias
                + pt * Cout * 4)                                  # f32 accumulator

    Pt = 2048
    while Pt > 128 and vmem_need(Pt) > 24 * 1024 * 1024:
        Pt //= 2
    Pt = min(Pt, _round_up(P, 8))       # both multiples of 8 -> Pt % 8 == 0
    Ppad = _round_up(P, Pt)
    T = Ppad // Pt

    if Ppad != P:                       # ragged last tile -> pad with zeros
        xs = [jnp.pad(xk, ((0, 0), (0, Ppad - P), (0, 0))) for xk in xs]

    # Cap well below physical VMEM (v7x has 64 MiB) to leave compiler headroom.
    vmem_limit = int(min(48 * 1024 * 1024,
                         max(32 * 1024 * 1024, vmem_need(Pt) + 8 * 1024 * 1024)))

    flops = 2 * N * P * 9 * Cin * Cout
    bytes_accessed = (3 * N * Ppad * 3 * Cin * x_b + N * Ppad * Cout * o_b
                      + 9 * Cin * Cout * x_b + Cout * 4)

    x_spec = pl.BlockSpec((1, Pt, 3 * Cin), lambda n, t: (n, t, 0))

    out_flat = pl.pallas_call(
        _downsample_kernel,
        out_shape=jax.ShapeDtypeStruct((N, Ppad, Cout), out_dtype),
        grid=(N, T),
        in_specs=[
            x_spec, x_spec, x_spec,
            pl.BlockSpec((3, 3 * Cin, Cout), lambda n, t: (0, 0, 0)),  # resident
            pl.BlockSpec((1, Cout), lambda n, t: (0, 0)),              # resident
        ],
        out_specs=pl.BlockSpec((1, Pt, Cout), lambda n, t: (n, t, 0)),
        compiler_params=pltpu.CompilerParams(
            dimension_semantics=("parallel", "parallel"),
            vmem_limit_bytes=vmem_limit,
        ),
        cost_estimate=pl.CostEstimate(
            flops=flops, transcendentals=0, bytes_accessed=bytes_accessed),
    )(xs[0], xs[1], xs[2], w, b2)

    out = out_flat[:, :P, :].reshape(N, Ho, Wo, Cout)
    return jnp.transpose(out, (0, 3, 1, 2))                      # back to NCHW


def init_downsample_params(key, in_ch, dtype=jnp.float32):
    """Mirror DownSample.initialize(): xavier_uniform_ weight, zero bias."""
    fan_in = in_ch * 3 * 3
    fan_out = in_ch * 3 * 3
    bound = math.sqrt(6.0 / (fan_in + fan_out))
    weight = jax.random.uniform(
        key, (in_ch, in_ch, 3, 3), dtype=dtype, minval=-bound, maxval=bound
    )
    bias = jnp.zeros((in_ch,), dtype=dtype)
    return weight, bias


if __name__ == "__main__":
    key = jax.random.PRNGKey(0)
    k_x, k_w, k_t = jax.random.split(key, 3)

    N, C, H, W = 2, 4, 16, 16
    x = jax.random.normal(k_x, (N, C, H, W), dtype=jnp.float32)
    temb = jax.random.normal(k_t, (N, 32), dtype=jnp.float32)      # unused by forward
    weight, bias = init_downsample_params(k_w, C)

    y = jax.jit(downsample_forward)(x, weight, bias, temb)
    y = jax.block_until_ready(y)
    assert y.shape == (N, C, H // 2, W // 2), y.shape

    # Reference check: same bf16-rounded inputs, exact-precision conv, so the
    # only difference vs the kernel's f32-accumulated MXU math is summation
    # order.
    xq = x.astype(jnp.bfloat16).astype(jnp.float32)
    wq = weight.astype(jnp.bfloat16).astype(jnp.float32)
    y_ref = jax.lax.conv_general_dilated(
        xq, wq,
        window_strides=(2, 2), padding=((1, 1), (1, 1)),
        dimension_numbers=("NCHW", "OIHW", "NCHW"),
        precision=jax.lax.Precision.HIGHEST,
    ) + bias.reshape(1, C, 1, 1)
    assert jnp.allclose(y, y_ref, atol=2e-3, rtol=2e-3), \
        float(jnp.max(jnp.abs(y - y_ref)))

    print("KERNEL_OK")
</pallas_src>

<mosaic_0001>
module attributes {stable_mosaic.version = 11 : i64} {
  func.func @_downsample_kernel(%arg0: i32, %arg1: i32, %arg2: memref<1x64x12xbf16, #tpu.memory_space<vmem>>, %arg3: memref<1x64x12xbf16, #tpu.memory_space<vmem>>, %arg4: memref<1x64x12xbf16, #tpu.memory_space<vmem>>, %arg5: memref<3x12x4xbf16, #tpu.memory_space<vmem>>, %arg6: memref<1x4xf32, #tpu.memory_space<vmem>>, %arg7: memref<1x64x4xf32, #tpu.memory_space<vmem>>) attributes {dimension_semantics = [#tpu.dimension_semantics<parallel>, #tpu.dimension_semantics<parallel>], iteration_bounds = array<i64: 2, 1>, scalar_prefetch = 0 : i64, scratch_operands = 0 : i64, tpu.core_type = #tpu.core_type<tc>, window_params = [{transform_indices = @transform_0, window_bounds = array<i64: 1, 64, 12>}, {transform_indices = @transform_1, window_bounds = array<i64: 1, 64, 12>}, {transform_indices = @transform_2, window_bounds = array<i64: 1, 64, 12>}, {pipeline_mode = #tpu.pipeline_mode<synchronous>, transform_indices = @transform_3, window_bounds = array<i64: 3, 12, 4>}, {pipeline_mode = #tpu.pipeline_mode<synchronous>, transform_indices = @transform_4, window_bounds = array<i64: 1, 4>}, {transform_indices = @transform_5, window_bounds = array<i64: 1, 64, 4>}]} {
    %c0 = arith.constant 0 : index
    %c0_0 = arith.constant 0 : index
    %c0_1 = arith.constant 0 : index
    %0 = vector.load %arg2[%c0, %c0_0, %c0_1] : memref<1x64x12xbf16, #tpu.memory_space<vmem>>, vector<1x64x12xbf16>
    %1 = vector.shape_cast %0 : vector<1x64x12xbf16> to vector<64x12xbf16>
    %c0_2 = arith.constant 0 : index
    %c0_3 = arith.constant 0 : index
    %c0_4 = arith.constant 0 : index
    %2 = vector.load %arg5[%c0_2, %c0_3, %c0_4] : memref<3x12x4xbf16, #tpu.memory_space<vmem>>, vector<1x12x4xbf16>
    %3 = vector.shape_cast %2 : vector<1x12x4xbf16> to vector<12x4xbf16>
    %cst = arith.constant dense<0.000000e+00> : vector<64x4xf32>
    %4 = tpu.matmul %1, %3, %cst {dimension_numbers = #tpu.dot_dimension_numbers<[1], [0], [0], [1], [0, 0, 1, 1], [], []>} : vector<64x12xbf16>, vector<12x4xbf16>, vector<64x4xf32> -> vector<64x4xf32>
    %c0_5 = arith.constant 0 : index
    %c0_6 = arith.constant 0 : index
    %c0_7 = arith.constant 0 : index
    %5 = vector.load %arg3[%c0_5, %c0_6, %c0_7] : memref<1x64x12xbf16, #tpu.memory_space<vmem>>, vector<1x64x12xbf16>
    %6 = vector.shape_cast %5 : vector<1x64x12xbf16> to vector<64x12xbf16>
    %c1 = arith.constant 1 : index
    %c0_8 = arith.constant 0 : index
    %c0_9 = arith.constant 0 : index
    %7 = vector.load %arg5[%c1, %c0_8, %c0_9] : memref<3x12x4xbf16, #tpu.memory_space<vmem>>, vector<1x12x4xbf16>
    %8 = vector.shape_cast %7 : vector<1x12x4xbf16> to vector<12x4xbf16>
    %cst_10 = arith.constant dense<0.000000e+00> : vector<64x4xf32>
    %9 = tpu.matmul %6, %8, %cst_10 {dimension_numbers = #tpu.dot_dimension_numbers<[1], [0], [0], [1], [0, 0, 1, 1], [], []>} : vector<64x12xbf16>, vector<12x4xbf16>, vector<64x4xf32> -> vector<64x4xf32>
    %10 = arith.addf %4, %9 : vector<64x4xf32>
    %c0_11 = arith.constant 0 : index
    %c0_12 = arith.constant 0 : index
    %c0_13 = arith.constant 0 : index
    %11 = vector.load %arg4[%c0_11, %c0_12, %c0_13] : memref<1x64x12xbf16, #tpu.memory_space<vmem>>, vector<1x64x12xbf16>
    %12 = vector.shape_cast %11 : vector<1x64x12xbf16> to vector<64x12xbf16>
    %c2 = arith.constant 2 : index
    %c0_14 = arith.constant 0 : index
    %c0_15 = arith.constant 0 : index
    %13 = vector.load %arg5[%c2, %c0_14, %c0_15] : memref<3x12x4xbf16, #tpu.memory_space<vmem>>, vector<1x12x4xbf16>
    %14 = vector.shape_cast %13 : vector<1x12x4xbf16> to vector<12x4xbf16>
    %cst_16 = arith.constant dense<0.000000e+00> : vector<64x4xf32>
    %15 = tpu.matmul %12, %14, %cst_16 {dimension_numbers = #tpu.dot_dimension_numbers<[1], [0], [0], [1], [0, 0, 1, 1], [], []>} : vector<64x12xbf16>, vector<12x4xbf16>, vector<64x4xf32> -> vector<64x4xf32>
    %16 = arith.addf %10, %15 : vector<64x4xf32>
    %c0_17 = arith.constant 0 : index
    %c0_18 = arith.constant 0 : index
    %17 = vector.load %arg6[%c0_17, %c0_18] : memref<1x4xf32, #tpu.memory_space<vmem>>, vector<1x4xf32>
    %18 = vector.broadcast %17 : vector<1x4xf32> to vector<64x4xf32>
    %19 = arith.addf %16, %18 : vector<64x4xf32>
    %c0_19 = arith.constant 0 : index
    %c0_20 = arith.constant 0 : index
    %c0_21 = arith.constant 0 : index
    %20 = vector.load %arg7[%c0_19, %c0_20, %c0_21] : memref<1x64x4xf32, #tpu.memory_space<vmem>>, vector<1x64x4xf32>
    %21 = vector.shape_cast %20 : vector<1x64x4xf32> to vector<64x4xf32>
    %22 = vector.shape_cast %19 : vector<64x4xf32> to vector<1x64x4xf32>
    tpu.vector_store %arg7[%c0_19, %c0_20, %c0_21], %22 {strides = array<i32>} : memref<1x64x4xf32, #tpu.memory_space<vmem>>, vector<1x64x4xf32>,
    return
  }
  func.func @transform_0(%arg0: i32, %arg1: i32) -> (i32, i32, i32) {
    %c0_i32 = arith.constant 0 : i32
    %c0_i32_0 = arith.constant 0 : i32
    return %arg0, %arg1, %c0_i32 : i32, i32, i32
  }
  func.func @transform_1(%arg0: i32, %arg1: i32) -> (i32, i32, i32) {
    %c0_i32 = arith.constant 0 : i32
    %c0_i32_0 = arith.constant 0 : i32
    return %arg0, %arg1, %c0_i32 : i32, i32, i32
  }
  func.func @transform_2(%arg0: i32, %arg1: i32) -> (i32, i32, i32) {
    %c0_i32 = arith.constant 0 : i32
    %c0_i32_0 = arith.constant 0 : i32
    return %arg0, %arg1, %c0_i32 : i32, i32, i32
  }
  func.func @transform_3(%arg0: i32, %arg1: i32) -> (i32, i32, i32) {
    %c0_i32 = arith.constant 0 : i32
    %c0_i32_0 = arith.constant 0 : i32
    %c0_i32_1 = arith.constant 0 : i32
    %c0_i32_2 = arith.constant 0 : i32
    return %c0_i32, %c0_i32_0, %c0_i32_1 : i32, i32, i32
  }
  func.func @transform_4(%arg0: i32, %arg1: i32) -> (i32, i32) {
    %c0_i32 = arith.constant 0 : i32
    %c0_i32_0 = arith.constant 0 : i32
    %c0_i32_1 = arith.constant 0 : i32
    return %c0_i32, %c0_i32_0 : i32, i32
  }
  func.func @transform_5(%arg0: i32, %arg1: i32) -> (i32, i32, i32) {
    %c0_i32 = arith.constant 0 : i32
    %c0_i32_0 = arith.constant 0 : i32
    return %arg0, %arg1, %c0_i32 : i32, i32, i32
  }
}

</mosaic_0001>

<bundles_post_ra>
// kernel: downsample_forward.1
= control target key start
LH: loop header
LB: loop body
LE: loop exit
PB: predicated region body
PF: predicated region fallthrough
CT: control target
= control target key end

     0   :  { %s1052_s18 = smov 0   ;;  %s1054_s19 = smov 0   ;;  %s1144_s0 = inlined_call_operand.vmem [shape: bf16[2,64,12], index: 0, kind: input, shape index: {}]   ;;  %s1145_s1 = inlined_call_operand.vmem [shape: bf16[2,64,12], index: 1, kind: input, shape index: {}]   ;;  %s1146_s2 = inlined_call_operand.vmem [shape: bf16[2,64,12], index: 2, kind: input, shape index: {}]   ;;  %s1147_s3 = inlined_call_operand.vmem [shape: bf16[3,12,4], index: 3, kind: input, shape index: {}]   ;;  %s1148_s4 = inlined_call_operand.vmem [shape: f32[1,4], index: 4, kind: input, shape index: {}]   ;;  %s1149_s5 = inlined_call_operand.vmem [shape: f32[2,64,4], index: 5, kind: output, shape index: {}]  }
   0x1   :  { %s1056_s20 = smov 0  }
   0x2 LB: > { %s27_s21 = sadd.s32 1, %s1016_s19  ;;  %p845_p0 = scmp.ge.s32.totalorder %s1020_s20, 1  ;;  %s1020_s20 = sphi %s1056_s20, %s15_s20   ;;  %s1016_s19 = sphi %s1054_s19, %s1151_s19   ;;  %s1012_s18 = sphi %s1052_s18, %s1150_s18  }
   0x3   : > { %p29_p1 = scmp.ge.s32.totalorder %s27_s21, 2  ;;  %p242_p2 = scmp.lt.s32.totalorder %s1020_s20, 3 }
   0x5   : > { %s1153_s21 = smov (%p29_p1, %s27_s21), 0  ;;  %p243_p3 = pnand %p845_p0, %p242_p2 }
   0x6   : > { %v983_v0 = vld [vmem:[%s1147_s3 + $0x8] sm:$0x3f] (!%p243_p3)   ;;  %vm396_vm0 = vcmask (!%p243_p3), 1045504   ;;  %p297_p4 = scmp.lt.s32.totalorder (!%p243_p3), %s1012_s18, 1  ;;  %v984_v1 = vld [vmem:[%s1147_s3] sm:$0x3f] (!%p243_p3)  }
   0x7   : > { %246 = sbr.rel (%p243_p3) target bundleno = 260 (0x104), region = 40  ;;  %955 = vmatprep.subr.msk.bf16.mxu1 (!%p243_p3), %vm396_vm0, %v983_v0  ;;  %v398_v2 = vsel (!%p243_p3), %vm396_vm0, %v983_v0, 0  ;;  %v987_v3 = vld [vmem:[%s1147_s3 + $0x10] sm:$0x3f] (!%p243_p3)   ;;  %956 = vmatprep.subr.msk.bf16.mxu0 (!%p243_p3), %vm396_vm0, %v984_v1  ;;  %v503_v4 = vsel (!%p243_p3), %vm396_vm0, %v984_v1, 0  ;;  %vm383_vm1 = vcmask (!%p243_p3), 97280  }
   0x8   : > { %908 = vmatpush3.bf16.msra.mxu1 (!%p243_p3), %v398_v2  ;;  %918 = vmatpush3.bf16.msra.mxu0 (!%p243_p3), %v503_v4  ;;  %v619_v9 = vsel (!%p243_p3), %vm396_vm0, %v987_v3, 0  ;;  %v885_v23 = vld [vmem:[%s1148_s4] ss:$0 sm:$0xff] (!%p243_p3)  ;;  %vm709_vm2 = vcmask (!%p243_p3), 31744  }
   0x9   : > { %957 = vmatprep.subr.msk.bf16.mxu1 (!%p243_p3), %vm396_vm0, %v984_v1  ;;  %958 = vmatprep.subr.msk.bf16.mxu0 (!%p243_p3), %vm396_vm0, %v987_v3 }
   0xe   : > { %s1155_s18 = smov (!%p297_p4, %s1012_s18), 1 }
   0xf   : > { %s888_s28 = sshll.u32 %s1155_s18, 5  ;;  %s891_s13 = sshll.u32 %s1155_s18, 6 }
  0x10   : > { %s314_s6 = scalar_lea.vmem %s1145_s1, %s888_s28  ;;  %s304_s9 = scalar_lea.vmem %s1144_s0, %s888_s28 }
  0x11   : > { %v985_v5 = vld [vmem:[%s314_s6] sm:$0xff]   ;;  %v988_v7 = vld [vmem:[%s314_s6 + $0x8] sm:$0xff]   ;;  %s324_s12 = scalar_lea.vmem %s1146_s2, %s888_s28  ;;  %v990_v10 = vld [vmem:[%s314_s6 + $0x10] sm:$0xff]   ;;  %s1117_s22 = scalar_lea.vmem %s1149_s5, %s891_s13 }
  0x12   : > { %v986_v6 = vld [vmem:[%s304_s9] sm:$0xff]   ;;  %909 = vmatprep.mubr.msk.bf16.mxu1 %vm383_vm1, %v985_v5  ;;  %v989_v8 = vld [vmem:[%s304_s9 + $0x8] sm:$0xff]   ;;  %v991_v12 = vld [vmem:[%s314_s6 + $0x18] sm:$0xff]  }
  0x13   : > { %919 = vmatprep.mubr.msk.bf16.mxu0 %vm383_vm1, %v986_v6  ;;  %910 = vmatmul.mubr.msk.bf16.vlgmr.msra.gmra.mrb[0].mxu1 %vm383_vm1, %v988_v7  ;;  %v992_v11 = vld [vmem:[%s324_s12] sm:$0xff]   ;;  %v994_v13 = vld [vmem:[%s304_s9 + $0x10] sm:$0xff]   ;;  %v993_v14 = vld [vmem:[%s324_s12 + $0x8] sm:$0xff]  }
  0x14   : > { %938 = vmatpush3.bf16.msra.mxu1 %v503_v4  ;;  %920 = vmatmul.mubr.msk.bf16.vlgmr.msra.gmra.mrb[0].mxu0 %vm383_vm1, %v989_v8  ;;  %v995_v15 = vld [vmem:[%s324_s12 + $0x10] sm:$0xff]   ;;  %v996_v16 = vld [vmem:[%s304_s9 + $0x18] sm:$0xff]  }
  0x15   : > { %928 = vmatpush3.bf16.msra.mxu0 %v619_v9  ;;  %913 = vmatprep.mubr.msk.bf16.mxu1 %vm383_vm1, %v990_v10  ;;  %v997_v17 = vld [vmem:[%s324_s12 + $0x18] sm:$0xff]  }
  0x16   : > { %929 = vmatprep.mubr.msk.bf16.mxu0 %vm383_vm1, %v992_v11 }
  0x1b   : > { %914 = vmatmul.mubr.msk.bf16.gmra.mrb[4].mxu1 %vm383_vm1, %v991_v12 }
  0x1c   : > { %923 = vmatprep.mubr.msk.bf16.mxu1 %vm383_vm1, %v994_v13 }
  0x20   : > { %930 = vmatmul.mubr.msk.bf16.vlgmr.msra.gmra.mrb[0].mxu0 %vm383_vm1, %v993_v14 }
  0x21   : > { %933 = vmatprep.mubr.msk.bf16.mxu0 %vm383_vm1, %v995_v15 }
  0x27   : > { %924 = vmatmul.mubr.msk.bf16.vlgmr.msra.gmra.mrb[4].mxu1 %vm383_vm1, %v996_v16 }
  0x28   : > { %934 = vmatmul.mubr.msk.bf16.gmra.mrb[4].mxu0 %vm383_vm1, %v997_v17 }
  0xe6   : > { %v911_v18 = vpop.f32.mrb[0].mxu1 }
  0xe7   : > { %v434_v19 = vpop.f32.mrb[1].mxu1 }
  0xe8   : > { %v912_v20 = vpop.f32.mrb[2].mxu1 }
  0xe9   : > { %v437_v21 = vpop.f32.mrb[3].mxu1 }
  0xf3   : > { %v931_v22 = vpop.f32.mrb[0].mxu0 }
  0xf4   : > { %v939_v24 = vadd.f32 %v931_v22, %v911_v18  ;;  %v655_v25 = vpop.f32.mrb[1].mxu0 }
  0xf5   : > { %v940_v26 = vadd.f32 %v655_v25, %v434_v19  ;;  %v932_v27 = vpop.f32.mrb[2].mxu0 }
  0xf6   : > { %v703_v28 = vadd.f32 %v939_v24, %v885_v23  ;;  %v941_v29 = vadd.f32 %v932_v27, %v912_v20  ;;  %v658_v30 = vpop.f32.mrb[3].mxu0 }
  0xf7   : > { %v701_v31 = vadd.f32 %v940_v26, %v885_v23  ;;  %v942_v32 = vadd.f32 %v658_v30, %v437_v21 }
  0xf8   : > { %712 = vst.msk [vmem:[%s1117_s22 + $0x10] sm:$0xff] %vm709_vm2, %v703_v28  ;;  %v704_v33 = vadd.f32 %v941_v29, %v885_v23 }
  0xf9   : > { %710 = vst.msk [vmem:[%s1117_s22] sm:$0xff] %vm709_vm2, %v701_v31  ;;  %v702_v34 = vadd.f32 %v942_v32, %v885_v23 }
  0xfa   : > { %713 = vst.msk [vmem:[%s1117_s22 + $0x18] sm:$0xff] %vm709_vm2, %v704_v33  ;;  %v925_v35 = vpop.f32.mrb[4].mxu1 }
  0xfb   : > { %711 = vst.msk [vmem:[%s1117_s22 + $0x8] sm:$0xff] %vm709_vm2, %v702_v34  ;;  %v935_v36 = vpop.f32.mrb[4].mxu0  ;;  %v555_v37 = vpop.f32.mrb[5].mxu1 }
  0xfc   : > { %v943_v38 = vadd.f32 %v935_v36, %v925_v35  ;;  %v671_v39 = vpop.f32.mrb[5].mxu0  ;;  %v926_v40 = vpop.f32.mrb[6].mxu1 }
  0xfd   : > { %v944_v41 = vadd.f32 %v671_v39, %v555_v37  ;;  %v936_v42 = vpop.f32.mrb[6].mxu0  ;;  %v558_v43 = vpop.f32.mrb[7].mxu1 }
  0xfe   : > { %v707_v44 = vadd.f32 %v943_v38, %v885_v23  ;;  %v945_v45 = vadd.f32 %v936_v42, %v926_v40  ;;  %v674_v46 = vpop.f32.mrb[7].mxu0 }
  0xff   : > { %v705_v47 = vadd.f32 %v944_v41, %v885_v23  ;;  %v946_v48 = vadd.f32 %v674_v46, %v558_v43 }
 0x100   : > { %716 = vst.msk [vmem:[%s1117_s22 + $0x30] sm:$0xff] %vm709_vm2, %v707_v44  ;;  %v708_v49 = vadd.f32 %v945_v45, %v885_v23 }
 0x101   : > { %714 = vst.msk [vmem:[%s1117_s22 + $0x20] sm:$0xff] %vm709_vm2, %v705_v47  ;;  %v706_v50 = vadd.f32 %v946_v48, %v885_v23 }
 0x102   : > { %717 = vst.msk [vmem:[%s1117_s22 + $0x38] sm:$0xff] %vm709_vm2, %v708_v49 }
 0x103   : > { %715 = vst.msk [vmem:[%s1117_s22 + $0x28] sm:$0xff] %vm709_vm2, %v706_v50 }
 0x104 PF: > { %s15_s20 = sadd.s32 1, %s1020_s20   ;;  %s1150_s18 = smov %s1016_s19 }
 0x105   : > { %p12_p5 = scmp.ge.s32.totalorder %s15_s20, 4   ;;  %s1151_s19 = smov %s1153_s21 }
 0x107   :  { %14 = sbr.rel (!%p12_p5) target bundleno = 2 (0x2), region = 78 }

</bundles_post_ra>
